<compile_context>
chip_gen: v7x
topology: tpu7x:2x2x1
jax: 0.10.0
libtpu: 0.0.40
codegen_flags: <defaults>
</compile_context>

<pallas_src>
import math
import numpy as np
import jax
import jax.numpy as jnp
from jax.experimental import pallas as pl
from jax.experimental.pallas import tpu as pltpu


def inverse_softplus(x, beta=1.0):
    # Numerically stable inverse softplus: log(exp(x*beta) - 1)/beta
    #                                    = x + log1p(-exp(-x*beta))/beta  (x*beta > 0)
    xb = np.asarray(x, dtype=np.float64) * beta
    with np.errstate(divide="ignore", invalid="ignore"):
        out = (xb + np.log1p(-np.exp(-xb))) / beta
    return np.asarray(out, dtype=np.float32)


def _stable_softplus(x):
    # softplus(x) = log(1 + exp(x)) = max(x, 0) + log1p(exp(-|x|))   (no overflow)
    return jnp.maximum(x, 0.0) + jnp.log1p(jnp.exp(-jnp.abs(x)))


# ----------------------------------------------------------------------------
# Scalar path: single Lagrange multiplier (spec-faithful forward()).
# ----------------------------------------------------------------------------
def _softplus_scalar_kernel(log_alpha_ref, alpha_ref):
    # log_alpha_ref: (1,) f32 in SMEM  -> scalar read, no padded input tile DMA.
    # alpha_ref:     (1, 1) f32 in VMEM (exp/log1p go through the vector EUP path).
    x = log_alpha_ref[0]
    xv = jnp.full((1, 1), x, dtype=jnp.float32)
    alpha_ref[...] = _stable_softplus(xv)


@jax.jit
def lagrange_forward(log_alpha):
    """log_alpha: (1,) float32. Returns softplus(log_alpha) as a 0-d device array."""
    out = pl.pallas_call(
        _softplus_scalar_kernel,
        out_shape=jax.ShapeDtypeStruct((1, 1), jnp.float32),
        in_specs=[pl.BlockSpec(memory_space=pltpu.MemorySpace.SMEM)],
        out_specs=pl.BlockSpec(memory_space=pltpu.MemorySpace.VMEM),
    )(log_alpha)
    # squeeze (not out[0, 0]) -> no extra slice; stays a device array for fusion.
    return jnp.squeeze(out)


# ----------------------------------------------------------------------------
# Batched path: many multipliers packed into one lane-dense (8,128) f32 slab.
# One vreg of softplus == one pallas_call for up to 1024 multipliers.
# ----------------------------------------------------------------------------
def _softplus_slab_kernel(x_ref, o_ref):
    # x_ref/o_ref: (8, 128) f32 in VMEM. Lane-dense output -> unmasked vst.
    o_ref[...] = _stable_softplus(x_ref[...])


@jax.jit
def lagrange_forward_slab(log_alpha_slab):
    """log_alpha_slab: (8, 128) float32. Returns softplus elementwise."""
    return pl.pallas_call(
        _softplus_slab_kernel,
        out_shape=jax.ShapeDtypeStruct(log_alpha_slab.shape, jnp.float32),
        in_specs=[pl.BlockSpec(memory_space=pltpu.MemorySpace.VMEM)],
        out_specs=pl.BlockSpec(memory_space=pltpu.MemorySpace.VMEM),
    )(log_alpha_slab)


class LagrangeLayer:
    """JAX/Pallas port of the PyTorch LagrangeLayer (single multiplier)."""

    def __init__(self, initial_value=0.0):
        if initial_value < 0.0:
            raise ValueError("initial_value must be >= 0 (inverse_softplus is NaN below 0)")
        # initial_value == 0.0 (PyTorch default) -> log_alpha = -inf; the stable
        # softplus in the kernel returns exactly 0.0 for it.
        self.log_alpha = jnp.asarray(
            inverse_softplus(initial_value), dtype=jnp.float32
        ).reshape(1)

    def __call__(self):
        return lagrange_forward(self.log_alpha)


class BatchedLagrangeLayer:
    """Many Lagrange multipliers in one lane-dense (8,128) slab, one kernel call."""

    SUBLANES, LANES = 8, 128

    def __init__(self, initial_values):
        vals = np.asarray(initial_values, dtype=np.float32).reshape(-1)
        if np.any(vals < 0.0):
            raise ValueError("all initial values must be >= 0")
        cap = self.SUBLANES * self.LANES
        if vals.shape[0] > cap:
            raise ValueError(f"at most {cap} multipliers per slab")
        self.n = int(vals.shape[0])
        slab = np.zeros((cap,), dtype=np.float32)  # padding log_alpha=0 -> softplus=ln2 (finite)
        slab[: self.n] = inverse_softplus(vals)
        self.log_alpha_slab = jnp.asarray(slab.reshape(self.SUBLANES, self.LANES))

    def __call__(self):
        # Full (8,128) alpha slab; consumers index / slice as needed.
        return lagrange_forward_slab(self.log_alpha_slab)

    def alphas(self):
        return self().reshape(-1)[: self.n]


if __name__ == "__main__":
    key = jax.random.PRNGKey(0)

    # --- single-multiplier (spec-faithful) forward ---
    initial_value = 1.0  # avoids the -inf parameter the spec's default 0.0 would give
    layer = LagrangeLayer(initial_value=initial_value)
    alpha = layer()
    jax.block_until_ready(alpha)

    # softplus(inverse_softplus(v)) == v
    assert abs(float(alpha) - initial_value) < 1e-5, (float(alpha), initial_value)
    # Cross-check against a host-side stable softplus of the stored parameter.
    la = float(layer.log_alpha[0])
    ref = max(la, 0.0) + math.log1p(math.exp(-abs(la)))
    assert abs(float(alpha) - ref) < 1e-6, (float(alpha), ref)

    # Default-init path (initial_value=0.0 -> log_alpha=-inf -> alpha=0.0, no NaN).
    layer0 = LagrangeLayer()
    alpha0 = layer0()
    jax.block_until_ready(alpha0)
    assert float(alpha0) == 0.0, float(alpha0)

    # --- batched lane-dense slab (perf feedback: amortize dispatch over many alphas) ---
    n = 5
    init_vals = np.asarray(jax.random.uniform(key, (n,), minval=0.5, maxval=2.0),
                           dtype=np.float32)
    batched = BatchedLagrangeLayer(init_vals)
    alphas = batched.alphas()
    jax.block_until_ready(alphas)
    np.testing.assert_allclose(np.asarray(alphas), init_vals, rtol=1e-5, atol=1e-5)

    # Full-slab check against jax.nn.softplus reference.
    slab_out = batched()
    jax.block_until_ready(slab_out)
    ref_slab = jax.nn.softplus(batched.log_alpha_slab)
    np.testing.assert_allclose(np.asarray(slab_out), np.asarray(ref_slab),
                               rtol=1e-6, atol=1e-6)

    print("KERNEL_OK")
</pallas_src>

<mosaic_0001>
module attributes {stable_mosaic.version = 11 : i64} {
  func.func @_softplus_scalar_kernel(%arg0: memref<1xf32, #tpu.memory_space<smem>>, %arg1: memref<1x1xf32, #tpu.memory_space<vmem>>) attributes {dimension_semantics = [], scalar_prefetch = 0 : i64, scratch_operands = 0 : i64, tpu.core_type = #tpu.core_type<tc>} {
    %c0 = arith.constant 0 : index
    %0 = memref.load %arg0[%c0] : memref<1xf32, #tpu.memory_space<smem>>
    %1 = vector.broadcast %0 : f32 to vector<1x1xf32>
    %cst = arith.constant 0.000000e+00 : f32
    %2 = vector.broadcast %cst : f32 to vector<1x1xf32>
    %3 = arith.maximumf %1, %2 : vector<1x1xf32>
    %4 = math.absf %1 : vector<1x1xf32>
    %cst_0 = arith.constant 0.000000e+00 : f32
    %5 = vector.broadcast %cst_0 : f32 to vector<1x1xf32>
    %6 = arith.subf %5, %4 : vector<1x1xf32>
    %7 = math.exp %6 : vector<1x1xf32>
    %8 = math.log1p %7 : vector<1x1xf32>
    %9 = arith.addf %3, %8 : vector<1x1xf32>
    %c0_1 = arith.constant 0 : index
    %c0_2 = arith.constant 0 : index
    %10 = vector.load %arg1[%c0_1, %c0_2] : memref<1x1xf32, #tpu.memory_space<vmem>>, vector<1x1xf32>
    tpu.vector_store %arg1[%c0_1, %c0_2], %9 {strides = array<i32>} : memref<1x1xf32, #tpu.memory_space<vmem>>, vector<1x1xf32>,
    return
  }
}

</mosaic_0001>

<bundles_post_ra>
// kernel: lagrange_forward.1
= control target key start
LH: loop header
LB: loop body
LE: loop exit
PB: predicated region body
PF: predicated region fallthrough
CT: control target
= control target key end

     0   :  { %s98_s0 = inlined_call_operand.<no memory space> [shape: f32[1], index: 0, kind: input, shape index: {}]   ;;  %s99_s1 = inlined_call_operand.hbm [shape: f32[1,1], index: 1, kind: output, shape index: {}]  }
   0x1   :  { %v11_v0 = vstv %s98_s0 }
   0x2   :  { %7 = vsyncpa [#allocation4], 0  ;;  %v13_v1 = vand.u32 2147483647, %v11_v0  ;;  %v12_v11 = vmax.f32 %v11_v0, 0.0  ;;  %s72_s8 = smov [#allocation3]  }
   0x3   :  { %s35_s9 = sshll.u32 %s72_s8, 4  ;;  %vm27_vm1 = vcmask 0   ;;  %s36_s9 = int_to_ptr.vmem [resolvable:$true] %s35_s9 }
   0x4   :  { %v14_v2 = vsub.f32 0.0, %v13_v1  ;;  %s48_s0 = scalar_lea.vmem %s36_s9, 16  ;;  %s52_s10 = scalar_lea.vmem %s36_s9, 32 }
   0x5   :  { %p49_p0 = scmp.ne.s32.totalorder %s36_s9, %s48_s0  ;;  %p53_p1 = scmp.lt.s32.totalorder %s36_s9, %s36_s9 }
   0x6   :  { %v15_v3 = vmul.f32 1.442695, %v14_v2  ;;  %p54_p2 = scmp.lt.s32.totalorder %s52_s10, %s48_s0 }
   0x8   :  { %44 = vpow2.f32 %v15_v3  ;;  %p55_p3 = por %p54_p2, %p53_p1 }
   0xa   :  { %p56_p4 = pnand %p55_p3, %p49_p0 }
  0x12   :  { %v45_v4 = vpop.eup %44 }
  0x13   :  { %v17_v5 = vadd.f32 1.0, %v45_v4  ;;  %v20_v6 = vmul.f32 -0.5, %v45_v4  ;;  %v23_v8 = vand.u32 2147483647, %v45_v4 }
  0x15   :  { %46 = vlog2.f32 %v17_v5  ;;  %v21_v7 = vadd.f32 1.0, %v20_v6  ;;  %vm24_vm0 = vcmp.lt.f32.partialorder %v23_v8, 0.0004427343 }
  0x17   :  { %v22_v9 = vmul.f32 %v45_v4, %v21_v7 }
  0x1f   :  { %v47_v10 = vpop.eup %46 }
  0x20   :  { %v19_v12 = vmul.f32 0.6931472, %v47_v10 }
  0x22   :  { %v25_v13 = vsel %vm24_vm0, %v22_v9, %v19_v12 }
  0x23   :  { %v26_v14 = vadd.f32 %v25_v13, %v12_v11 }
  0x25   :  { %28 = vst.msk [vmem:[#allocation3] sm:$0x1] %vm27_vm1, %v26_v14 }
  0x26   :  { %59 = shalt.err (!%p56_p4)
}
  0x27   :  { %s60_s13 = scalar_lea.hbm %s99_s1, 16 }
  0x28   :  { %p61_p5 = scmp.ne.s32.totalorder %s99_s1, %s60_s13  ;;  %p64_p6 = scmp.lt.u32.totalorder %s60_s13, %s99_s1 }
  0x2a   :  { %p66_p7 = pnand %p64_p6, %p61_p5 }
  0x2c   :  { %69 = shalt.err (!%p66_p7)
}
  0x2d   :  { %38 = dma.vmem_to_hbm [thread:$0]  %s36_s9, 16, %s99_s1, [#allocation4]  }
  0x2e   :  { %70 = dma.done.wait [#allocation4], 16  }
  0x2f   :  { %71 = vsyncadd [#allocation4], 4294967280 }
  0x30   :  { %42 = vsyncpa [#allocation4], 1 }

</bundles_post_ra>
